<compile_context>
chip_gen: v5e
topology: v5e:2x2
jax: 0.10.0
libtpu: 0.0.40
codegen_flags: <defaults>
</compile_context>

<pallas_src>
import functools

import jax
import jax.numpy as jnp
from jax.experimental import pallas as pl
from jax.experimental.pallas import tpu as pltpu

# ---- model hyper-parameters (toy sizes) -------------------------------------
B = 2          # batch
C = 3          # channels of the toy 3-channel time series
L = 16         # observed sequence length per channel
F = 64         # continuous-conv feature size fed to the encoder
H = 128        # MLP hidden width (== lane width, keeps every matmul lane-dense)
Z = 16         # latent size
R = 32         # number of decoder reference time points
MAX_TIME = 5.0
SIGMA = 0.5    # RBF bandwidth of the grid decoder

ZB = 2 * B     # fused decoder batch ([z_gen ; z_T])
CL = C * L     # 48 lane-dense flattened time-series width
CR = C * R     # 96 lane-dense (channel, ref-point) width

# ---- bf16 weight slab layout (rows of 128 lanes) ----------------------------
ENC_BASE = 0          # encoder W1 | W2 | W3   (3*H rows)
DEC_BASE = 3 * H      # decoder W1 | W2 | W3   (3*H rows)
WSLAB_ROWS = 6 * H    # 768

# ---- f32 data/const slab layout ---------------------------------------------
ROW_CCONV = 0                 # B rows : cconv features   (lanes 0:F)
ROW_ZGEN = B                  # B rows : z_gen            (lanes 0:Z)
ROW_DATA = 2 * B              # B rows : data  flattened  (lanes 0:CL, lane=c*L+l)
ROW_MASK = 3 * B              # B rows : mask  flattened  (lanes 0:CL)
ROW_TREF = 4 * B              # 1 row  : tref tiled       (lanes 0:CR, lane c*R+r=tref[r])
ROW_EB1 = ROW_TREF + 1
ROW_EB2 = ROW_TREF + 2
ROW_EB3 = ROW_TREF + 3        # mu-only, lanes Z: are zero
ROW_DB1 = ROW_TREF + 4
ROW_DB2 = ROW_TREF + 5
ROW_DB3 = ROW_TREF + 6        # lanes 0:CR valid
FSLAB_ROWS = ROW_TREF + 7     # 15

# ---- merged output slab layout ----------------------------------------------
OUT_X = 0                     # ZB rows : [x_gen ; x_recon] flattened (lanes 0:CL)
OUT_Z = ZB                    # B rows  : z_T (lanes 0:Z valid)
OUT_LOSS = ZB + B             # 1 row   : ae_loss broadcast over 128 lanes
OUT_ROWS = ZB + B + 1         # 7


def _pbigan_kernel(wslab_ref, fslab_ref, texp_ref, out_ref):
    f32 = jnp.float32
    bf16 = jnp.bfloat16

    def bias(row):
        return fslab_ref[row:row + 1, :]                       # (1, 128) f32

    def mlp(x, base, rb1, rb2, rb3):
        """3-layer MLP; bf16 MXU operands, f32 accumulation + f32 epilogues."""
        h = jnp.dot(x.astype(bf16), wslab_ref[base:base + H, :],
                    preferred_element_type=f32) + bias(rb1)
        h = jnp.maximum(h, 0.0)
        h = jnp.dot(h.astype(bf16), wslab_ref[base + H:base + 2 * H, :],
                    preferred_element_type=f32) + bias(rb2)
        h = jnp.maximum(h, 0.0)
        return jnp.dot(h.astype(bf16), wslab_ref[base + 2 * H:base + 3 * H, :],
                       preferred_element_type=f32) + bias(rb3)

    # ---------------- encoder: cconv feature -> mu (eval-mode z_T) -----------
    cconv = fslab_ref[ROW_CCONV:ROW_CCONV + B, :]              # (B,128), lanes F: zero
    z_t = mlp(cconv, ENC_BASE, ROW_EB1, ROW_EB2, ROW_EB3)      # (B,128), lanes Z: zero

    # ---------------- fused decoder on [z_gen ; z_T] --------------------------
    z_gen = fslab_ref[ROW_ZGEN:ROW_ZGEN + B, :]                # (B,128), lanes Z: zero
    z_cat = jnp.concatenate([z_gen, z_t], axis=0)              # (ZB,128)
    grid = mlp(z_cat, DEC_BASE, ROW_DB1, ROW_DB2, ROW_DB3)     # (ZB,128), lanes 0:CR

    # ---------------- RBF interpolation, lane-dense (ZB, L, C*R) --------------
    tref = fslab_ref[ROW_TREF:ROW_TREF + 1, 0:CR]              # (1, CR)
    d = texp_ref[...] - tref[None, :, :]                       # (ZB, L, CR)
    w = jnp.exp(d * d * (-0.5 / (SIGMA * SIGMA)))              # (ZB, L, CR), f32 EUP
    grid96 = grid[:, 0:CR]                                     # (ZB, CR) contiguous lanes
    prod = w * grid96[:, None, :]                              # (ZB, L, CR)

    # per-channel segmented reduction over R; concat lands in lane = c*L + l,
    # i.e. the natural flatten of (ZB, C, L) -- no in-kernel transpose needed.
    xs = []
    for c in range(C):
        sl = slice(c * R, (c + 1) * R)
        num = jnp.sum(prod[:, :, sl], axis=-1)                 # (ZB, L)
        den = jnp.sum(w[:, :, sl], axis=-1)                    # (ZB, L)
        xs.append(num * pl.reciprocal(den + 1e-6, approx=True))
    x = jnp.concatenate(xs, axis=-1)                           # (ZB, CL)

    # ------ masked MSE: ((x_recon - data)^2 * mask).sum((-1,-2)).mean() -------
    data = fslab_ref[ROW_DATA:ROW_DATA + B, 0:CL]              # (B, CL)
    mask = fslab_ref[ROW_MASK:ROW_MASK + B, 0:CL]              # (B, CL)
    diff = x[B:ZB, :] - data
    l2 = diff * diff * mask                                    # (B, CL)
    lsum = jnp.sum(jnp.sum(l2, axis=0, keepdims=True), axis=1, keepdims=True)  # (1,1)
    loss_row = (lsum * (1.0 / B)) * jnp.ones((1, H), f32)      # broadcast into one row

    # ---------------- single merged output slab -------------------------------
    out_ref[OUT_X:OUT_X + ZB, 0:CL] = x                        # rows 0:B x_gen, B:2B x_recon
    out_ref[OUT_Z:OUT_Z + B, :] = z_t
    out_ref[OUT_LOSS:OUT_LOSS + 1, :] = loss_row


def pack_params(params):
    """One-time host-side packing of parameters into kernel slabs."""
    f32 = jnp.float32

    # encoder weights padded to (H,H); mu-only columns kept for W3.
    ew1 = jnp.zeros((H, H), f32).at[:F, :].set(params["ew1"])
    ew3 = jnp.zeros((H, H), f32).at[:, :Z].set(params["ew3"][:, :Z])
    # decoder weights padded to (H,H); dw3 flattened so output lane = c*R + r.
    dw1 = jnp.zeros((H, H), f32).at[:Z, :].set(params["dw1"])
    dw3_flat = jnp.transpose(params["dw3"], (1, 0, 2)).reshape(H, CR)
    dw3 = jnp.zeros((H, H), f32).at[:, :CR].set(dw3_flat)
    wslab = jnp.concatenate(
        [ew1, params["ew2"], ew3, dw1, params["dw2"], dw3],
        axis=0).astype(jnp.bfloat16)                           # (768, 128) bf16

    def row(vec, width):
        return jnp.zeros((1, H), f32).at[:, :width].set(vec.reshape(1, width))

    tref = jnp.linspace(0.0, MAX_TIME, R, dtype=f32)
    tref_tile = jnp.tile(tref, C)                              # lane c*R+r -> tref[r]
    db3_flat = jnp.transpose(params["db3"], (1, 0, 2)).reshape(1, CR)
    const_rows = jnp.concatenate(
        [row(tref_tile, CR),
         row(params["eb1"], H), row(params["eb2"], H),
         row(params["eb3"][:, :Z], Z),
         row(params["db1"], H), row(params["db2"], H),
         row(db3_flat, CR)], axis=0)                           # (7, 128) f32
    return wslab, const_rows


def pbigan_forward(wslab, const_rows, cconv_feat, data, time, mask,
                   time_t, mask_t, z_gen):
    """Returns (z_T, x_recon, z_gen, x_gen, ae_loss) like PBiGAN.forward.

    mask_t is part of the reference signature but unused by this decoder
    (it is only consumed by the discriminator path in the original model).
    """
    del mask_t
    f32 = jnp.float32

    def pad_lanes(a, width):
        return jnp.pad(a.astype(f32), ((0, 0), (0, H - width)))

    # per-step f32 slab: [cconv | z_gen | data | mask | consts]
    fslab = jnp.concatenate(
        [pad_lanes(cconv_feat, F),
         pad_lanes(z_gen, Z),
         pad_lanes(data.reshape(B, CL), CL),
         pad_lanes(mask.reshape(B, CL), CL),
         const_rows], axis=0)                                  # (15, 128)

    # expanded time tensor (pure layout plumbing): t_exp[b, l, c*R+r] = t[b, c, l]
    t_cat = jnp.concatenate([time_t, time], axis=0)            # (ZB, C, L)
    t_exp = jnp.transpose(t_cat, (0, 2, 1))[..., None]         # (ZB, L, C, 1)
    t_exp = jnp.broadcast_to(t_exp, (ZB, L, C, R)).reshape(ZB, L, CR).astype(f32)

    vmem = pl.BlockSpec(memory_space=pltpu.MemorySpace.VMEM)
    out = pl.pallas_call(
        _pbigan_kernel,
        out_shape=jax.ShapeDtypeStruct((OUT_ROWS, H), f32),
        in_specs=[vmem, vmem, vmem],
        out_specs=vmem,
    )(wslab, fslab, t_exp)

    x_all = out[OUT_X:OUT_X + ZB, :CL].reshape(ZB, C, L)
    x_gen = x_all[:B]
    x_recon = x_all[B:]
    z_T = out[OUT_Z:OUT_Z + B, :Z]
    ae_loss = out[OUT_LOSS, 0]
    return z_T, x_recon, z_gen, x_gen, ae_loss


def init_params(key):
    ks = jax.random.split(key, 6)
    s = 0.1
    return {
        # encoder MLP: F -> H -> H -> 2Z  (only the mu half is used downstream)
        "ew1": jax.random.normal(ks[0], (F, H), jnp.float32) * s,
        "eb1": jnp.zeros((1, H), jnp.float32),
        "ew2": jax.random.normal(ks[1], (H, H), jnp.float32) * s,
        "eb2": jnp.zeros((1, H), jnp.float32),
        "ew3": jax.random.normal(ks[2], (H, 2 * Z), jnp.float32) * s,
        "eb3": jnp.zeros((1, 2 * Z), jnp.float32),
        # decoder MLP: Z -> H -> H -> (C, R) grid values
        "dw1": jax.random.normal(ks[3], (Z, H), jnp.float32) * s,
        "db1": jnp.zeros((1, H), jnp.float32),
        "dw2": jax.random.normal(ks[4], (H, H), jnp.float32) * s,
        "db2": jnp.zeros((1, H), jnp.float32),
        "dw3": jax.random.normal(ks[5], (C, H, R), jnp.float32) * s,
        "db3": jnp.zeros((C, 1, R), jnp.float32),
    }


if __name__ == "__main__":
    root = jax.random.PRNGKey(0)
    kp, kd, kt, km, ktt, kc, kz = jax.random.split(root, 7)

    params = init_params(kp)
    wslab, const_rows = pack_params(params)        # packed once, outside the jit

    data = jax.random.normal(kd, (B, C, L), jnp.float32)
    time = jax.random.uniform(kt, (B, C, L), jnp.float32, 0.0, MAX_TIME)
    mask = (jax.random.uniform(km, (B, C, L)) > 0.3).astype(jnp.float32)
    time_t = jax.random.uniform(ktt, (B, C, L), jnp.float32, 0.0, MAX_TIME)
    mask_t = jnp.ones((B, C, L), jnp.float32)
    cconv_feat = jax.random.normal(kc, (B, F), jnp.float32)
    # torch.empty_like(z_T).normal_() replaced with deterministic JAX sampling:
    z_gen = jax.random.normal(kz, (B, Z), jnp.float32)

    fwd = jax.jit(functools.partial(pbigan_forward, wslab, const_rows))
    z_T, x_recon, z_gen_out, x_gen, ae_loss = fwd(
        cconv_feat, data, time, mask, time_t, mask_t, z_gen)
    jax.block_until_ready((z_T, x_recon, z_gen_out, x_gen, ae_loss))

    assert z_T.shape == (B, Z)
    assert x_recon.shape == (B, C, L)
    assert x_gen.shape == (B, C, L)
    assert ae_loss.shape == ()
    assert bool(jnp.isfinite(ae_loss))
    print("KERNEL_OK")
</pallas_src>

<mosaic_0001>
module attributes {stable_mosaic.version = 11 : i64} {
  func.func @_pbigan_kernel(%arg0: memref<768x128xbf16, #tpu.memory_space<vmem>>, %arg1: memref<15x128xf32, #tpu.memory_space<vmem>>, %arg2: memref<4x16x96xf32, #tpu.memory_space<vmem>>, %arg3: memref<7x128xf32, #tpu.memory_space<vmem>>) attributes {dimension_semantics = [], scalar_prefetch = 0 : i64, scratch_operands = 0 : i64, tpu.core_type = #tpu.core_type<tc>} {
    %c0 = arith.constant 0 : index
    %c0_0 = arith.constant 0 : index
    %0 = vector.load %arg1[%c0, %c0_0] : memref<15x128xf32, #tpu.memory_space<vmem>>, vector<2x128xf32>
    %1 = arith.truncf %0 : vector<2x128xf32> to vector<2x128xbf16>
    %c0_1 = arith.constant 0 : index
    %c0_2 = arith.constant 0 : index
    %2 = vector.load %arg0[%c0_1, %c0_2] : memref<768x128xbf16, #tpu.memory_space<vmem>>, vector<128x128xbf16>
    %cst = arith.constant dense<0.000000e+00> : vector<2x128xf32>
    %3 = tpu.matmul %1, %2, %cst {dimension_numbers = #tpu.dot_dimension_numbers<[1], [0], [0], [1], [0, 0, 1, 1], [], []>} : vector<2x128xbf16>, vector<128x128xbf16>, vector<2x128xf32> -> vector<2x128xf32>
    %c9 = arith.constant 9 : index
    %c0_3 = arith.constant 0 : index
    %4 = vector.load %arg1[%c9, %c0_3] : memref<15x128xf32, #tpu.memory_space<vmem>>, vector<1x128xf32>
    %5 = vector.broadcast %4 : vector<1x128xf32> to vector<2x128xf32>
    %6 = arith.addf %3, %5 : vector<2x128xf32>
    %cst_4 = arith.constant 0.000000e+00 : f32
    %7 = vector.broadcast %cst_4 : f32 to vector<2x128xf32>
    %8 = arith.maximumf %6, %7 : vector<2x128xf32>
    %9 = arith.truncf %8 : vector<2x128xf32> to vector<2x128xbf16>
    %c128 = arith.constant 128 : index
    %c0_5 = arith.constant 0 : index
    %10 = vector.load %arg0[%c128, %c0_5] : memref<768x128xbf16, #tpu.memory_space<vmem>>, vector<128x128xbf16>
    %cst_6 = arith.constant dense<0.000000e+00> : vector<2x128xf32>
    %11 = tpu.matmul %9, %10, %cst_6 {dimension_numbers = #tpu.dot_dimension_numbers<[1], [0], [0], [1], [0, 0, 1, 1], [], []>} : vector<2x128xbf16>, vector<128x128xbf16>, vector<2x128xf32> -> vector<2x128xf32>
    %c10 = arith.constant 10 : index
    %c0_7 = arith.constant 0 : index
    %12 = vector.load %arg1[%c10, %c0_7] : memref<15x128xf32, #tpu.memory_space<vmem>>, vector<1x128xf32>
    %13 = vector.broadcast %12 : vector<1x128xf32> to vector<2x128xf32>
    %14 = arith.addf %11, %13 : vector<2x128xf32>
    %cst_8 = arith.constant 0.000000e+00 : f32
    %15 = vector.broadcast %cst_8 : f32 to vector<2x128xf32>
    %16 = arith.maximumf %14, %15 : vector<2x128xf32>
    %17 = arith.truncf %16 : vector<2x128xf32> to vector<2x128xbf16>
    %c256 = arith.constant 256 : index
    %c0_9 = arith.constant 0 : index
    %18 = vector.load %arg0[%c256, %c0_9] : memref<768x128xbf16, #tpu.memory_space<vmem>>, vector<128x128xbf16>
    %cst_10 = arith.constant dense<0.000000e+00> : vector<2x128xf32>
    %19 = tpu.matmul %17, %18, %cst_10 {dimension_numbers = #tpu.dot_dimension_numbers<[1], [0], [0], [1], [0, 0, 1, 1], [], []>} : vector<2x128xbf16>, vector<128x128xbf16>, vector<2x128xf32> -> vector<2x128xf32>
    %c11 = arith.constant 11 : index
    %c0_11 = arith.constant 0 : index
    %20 = vector.load %arg1[%c11, %c0_11] : memref<15x128xf32, #tpu.memory_space<vmem>>, vector<1x128xf32>
    %21 = vector.broadcast %20 : vector<1x128xf32> to vector<2x128xf32>
    %22 = arith.addf %19, %21 : vector<2x128xf32>
    %c2 = arith.constant 2 : index
    %c0_12 = arith.constant 0 : index
    %23 = vector.load %arg1[%c2, %c0_12] : memref<15x128xf32, #tpu.memory_space<vmem>>, vector<2x128xf32>
    %24 = tpu.concatenate %23, %22 in 0 : vector<2x128xf32>, vector<2x128xf32> -> vector<4x128xf32>
    %25 = arith.truncf %24 : vector<4x128xf32> to vector<4x128xbf16>
    %c384 = arith.constant 384 : index
    %c0_13 = arith.constant 0 : index
    %26 = vector.load %arg0[%c384, %c0_13] : memref<768x128xbf16, #tpu.memory_space<vmem>>, vector<128x128xbf16>
    %cst_14 = arith.constant dense<0.000000e+00> : vector<4x128xf32>
    %27 = tpu.matmul %25, %26, %cst_14 {dimension_numbers = #tpu.dot_dimension_numbers<[1], [0], [0], [1], [0, 0, 1, 1], [], []>} : vector<4x128xbf16>, vector<128x128xbf16>, vector<4x128xf32> -> vector<4x128xf32>
    %c12 = arith.constant 12 : index
    %c0_15 = arith.constant 0 : index
    %28 = vector.load %arg1[%c12, %c0_15] : memref<15x128xf32, #tpu.memory_space<vmem>>, vector<1x128xf32>
    %29 = vector.broadcast %28 : vector<1x128xf32> to vector<4x128xf32>
    %30 = arith.addf %27, %29 : vector<4x128xf32>
    %cst_16 = arith.constant 0.000000e+00 : f32
    %31 = vector.broadcast %cst_16 : f32 to vector<4x128xf32>
    %32 = arith.maximumf %30, %31 : vector<4x128xf32>
    %33 = arith.truncf %32 : vector<4x128xf32> to vector<4x128xbf16>
    %c512 = arith.constant 512 : index
    %c0_17 = arith.constant 0 : index
    %34 = vector.load %arg0[%c512, %c0_17] : memref<768x128xbf16, #tpu.memory_space<vmem>>, vector<128x128xbf16>
    %cst_18 = arith.constant dense<0.000000e+00> : vector<4x128xf32>
    %35 = tpu.matmul %33, %34, %cst_18 {dimension_numbers = #tpu.dot_dimension_numbers<[1], [0], [0], [1], [0, 0, 1, 1], [], []>} : vector<4x128xbf16>, vector<128x128xbf16>, vector<4x128xf32> -> vector<4x128xf32>
    %c13 = arith.constant 13 : index
    %c0_19 = arith.constant 0 : index
    %36 = vector.load %arg1[%c13, %c0_19] : memref<15x128xf32, #tpu.memory_space<vmem>>, vector<1x128xf32>
    %37 = vector.broadcast %36 : vector<1x128xf32> to vector<4x128xf32>
    %38 = arith.addf %35, %37 : vector<4x128xf32>
    %cst_20 = arith.constant 0.000000e+00 : f32
    %39 = vector.broadcast %cst_20 : f32 to vector<4x128xf32>
    %40 = arith.maximumf %38, %39 : vector<4x128xf32>
    %41 = arith.truncf %40 : vector<4x128xf32> to vector<4x128xbf16>
    %c640 = arith.constant 640 : index
    %c0_21 = arith.constant 0 : index
    %42 = vector.load %arg0[%c640, %c0_21] : memref<768x128xbf16, #tpu.memory_space<vmem>>, vector<128x128xbf16>
    %cst_22 = arith.constant dense<0.000000e+00> : vector<4x128xf32>
    %43 = tpu.matmul %41, %42, %cst_22 {dimension_numbers = #tpu.dot_dimension_numbers<[1], [0], [0], [1], [0, 0, 1, 1], [], []>} : vector<4x128xbf16>, vector<128x128xbf16>, vector<4x128xf32> -> vector<4x128xf32>
    %c14 = arith.constant 14 : index
    %c0_23 = arith.constant 0 : index
    %44 = vector.load %arg1[%c14, %c0_23] : memref<15x128xf32, #tpu.memory_space<vmem>>, vector<1x128xf32>
    %45 = vector.broadcast %44 : vector<1x128xf32> to vector<4x128xf32>
    %46 = arith.addf %43, %45 : vector<4x128xf32>
    %c8 = arith.constant 8 : index
    %c0_24 = arith.constant 0 : index
    %47 = vector.load %arg1[%c8, %c0_24] : memref<15x128xf32, #tpu.memory_space<vmem>>, vector<1x96xf32>
    %c0_25 = arith.constant 0 : index
    %c0_26 = arith.constant 0 : index
    %c0_27 = arith.constant 0 : index
    %48 = vector.load %arg2[%c0_25, %c0_26, %c0_27] : memref<4x16x96xf32, #tpu.memory_space<vmem>>, vector<4x16x96xf32>
    %49 = vector.shape_cast %47 : vector<1x96xf32> to vector<1x1x96xf32>
    %50 = vector.broadcast %49 : vector<1x1x96xf32> to vector<4x16x96xf32>
    %51 = arith.subf %48, %50 : vector<4x16x96xf32>
    %52 = arith.mulf %51, %51 : vector<4x16x96xf32>
    %cst_28 = arith.constant -2.000000e+00 : f32
    %53 = vector.broadcast %cst_28 : f32 to vector<4x16x96xf32>
    %54 = arith.mulf %52, %53 : vector<4x16x96xf32>
    %55 = math.exp %54 : vector<4x16x96xf32>
    %56 = vector.extract_strided_slice %46 {offsets = [0, 0], sizes = [4, 96], strides = [1, 1]} : vector<4x128xf32> to vector<4x96xf32>
    %57 = vector.shape_cast %56 : vector<4x96xf32> to vector<4x1x96xf32>
    %58 = vector.broadcast %57 : vector<4x1x96xf32> to vector<4x16x96xf32>
    %59 = arith.mulf %55, %58 : vector<4x16x96xf32>
    %60 = vector.extract_strided_slice %59 {offsets = [0, 0, 0], sizes = [4, 16, 32], strides = [1, 1, 1]} : vector<4x16x96xf32> to vector<4x16x32xf32>
    %cst_29 = arith.constant dense<0.000000e+00> : vector<4x16xf32>
    %61 = vector.multi_reduction <add>, %60, %cst_29 [2] : vector<4x16x32xf32> to vector<4x16xf32>
    %62 = vector.extract_strided_slice %55 {offsets = [0, 0, 0], sizes = [4, 16, 32], strides = [1, 1, 1]} : vector<4x16x96xf32> to vector<4x16x32xf32>
    %cst_30 = arith.constant dense<0.000000e+00> : vector<4x16xf32>
    %63 = vector.multi_reduction <add>, %62, %cst_30 [2] : vector<4x16x32xf32> to vector<4x16xf32>
    %cst_31 = arith.constant 9.99999997E-7 : f32
    %64 = vector.broadcast %cst_31 : f32 to vector<4x16xf32>
    %65 = arith.addf %63, %64 : vector<4x16xf32>
    %66 = tpu.reciprocal %65 {approx = true} : vector<4x16xf32> -> vector<4x16xf32>
    %67 = arith.mulf %61, %66 : vector<4x16xf32>
    %68 = vector.extract_strided_slice %59 {offsets = [0, 0, 32], sizes = [4, 16, 32], strides = [1, 1, 1]} : vector<4x16x96xf32> to vector<4x16x32xf32>
    %cst_32 = arith.constant dense<0.000000e+00> : vector<4x16xf32>
    %69 = vector.multi_reduction <add>, %68, %cst_32 [2] : vector<4x16x32xf32> to vector<4x16xf32>
    %70 = vector.extract_strided_slice %55 {offsets = [0, 0, 32], sizes = [4, 16, 32], strides = [1, 1, 1]} : vector<4x16x96xf32> to vector<4x16x32xf32>
    %cst_33 = arith.constant dense<0.000000e+00> : vector<4x16xf32>
    %71 = vector.multi_reduction <add>, %70, %cst_33 [2] : vector<4x16x32xf32> to vector<4x16xf32>
    %cst_34 = arith.constant 9.99999997E-7 : f32
    %72 = vector.broadcast %cst_34 : f32 to vector<4x16xf32>
    %73 = arith.addf %71, %72 : vector<4x16xf32>
    %74 = tpu.reciprocal %73 {approx = true} : vector<4x16xf32> -> vector<4x16xf32>
    %75 = arith.mulf %69, %74 : vector<4x16xf32>
    %76 = vector.extract_strided_slice %59 {offsets = [0, 0, 64], sizes = [4, 16, 32], strides = [1, 1, 1]} : vector<4x16x96xf32> to vector<4x16x32xf32>
    %cst_35 = arith.constant dense<0.000000e+00> : vector<4x16xf32>
    %77 = vector.multi_reduction <add>, %76, %cst_35 [2] : vector<4x16x32xf32> to vector<4x16xf32>
    %78 = vector.extract_strided_slice %55 {offsets = [0, 0, 64], sizes = [4, 16, 32], strides = [1, 1, 1]} : vector<4x16x96xf32> to vector<4x16x32xf32>
    %cst_36 = arith.constant dense<0.000000e+00> : vector<4x16xf32>
    %79 = vector.multi_reduction <add>, %78, %cst_36 [2] : vector<4x16x32xf32> to vector<4x16xf32>
    %cst_37 = arith.constant 9.99999997E-7 : f32
    %80 = vector.broadcast %cst_37 : f32 to vector<4x16xf32>
    %81 = arith.addf %79, %80 : vector<4x16xf32>
    %82 = tpu.reciprocal %81 {approx = true} : vector<4x16xf32> -> vector<4x16xf32>
    %83 = arith.mulf %77, %82 : vector<4x16xf32>
    %84 = tpu.concatenate %67, %75, %83 in 1 : vector<4x16xf32>, vector<4x16xf32>, vector<4x16xf32> -> vector<4x48xf32>
    %c4 = arith.constant 4 : index
    %c0_38 = arith.constant 0 : index
    %85 = vector.load %arg1[%c4, %c0_38] : memref<15x128xf32, #tpu.memory_space<vmem>>, vector<2x48xf32>
    %c6 = arith.constant 6 : index
    %c0_39 = arith.constant 0 : index
    %86 = vector.load %arg1[%c6, %c0_39] : memref<15x128xf32, #tpu.memory_space<vmem>>, vector<2x48xf32>
    %87 = vector.extract_strided_slice %84 {offsets = [2, 0], sizes = [2, 48], strides = [1, 1]} : vector<4x48xf32> to vector<2x48xf32>
    %88 = arith.subf %87, %85 : vector<2x48xf32>
    %89 = arith.mulf %88, %88 : vector<2x48xf32>
    %90 = arith.mulf %89, %86 : vector<2x48xf32>
    %cst_40 = arith.constant dense<0.000000e+00> : vector<48xf32>
    %91 = vector.multi_reduction <add>, %90, %cst_40 [0] : vector<2x48xf32> to vector<48xf32>
    %92 = vector.shape_cast %91 : vector<48xf32> to vector<1x48xf32>
    %cst_41 = arith.constant dense<0.000000e+00> : vector<1xf32>
    %93 = vector.multi_reduction <add>, %92, %cst_41 [1] : vector<1x48xf32> to vector<1xf32>
    %94 = vector.shape_cast %93 : vector<1xf32> to vector<1x1xf32>
    %cst_42 = arith.constant 5.000000e-01 : f32
    %95 = vector.broadcast %cst_42 : f32 to vector<1x1xf32>
    %96 = arith.mulf %94, %95 : vector<1x1xf32>
    %cst_43 = arith.constant 1.000000e+00 : f32
    %97 = vector.broadcast %cst_43 : f32 to vector<1x128xf32>
    %98 = vector.broadcast %96 : vector<1x1xf32> to vector<1x128xf32>
    %99 = arith.mulf %98, %97 : vector<1x128xf32>
    %c0_44 = arith.constant 0 : index
    %c0_45 = arith.constant 0 : index
    %100 = vector.load %arg3[%c0_44, %c0_45] : memref<7x128xf32, #tpu.memory_space<vmem>>, vector<4x48xf32>
    tpu.vector_store %arg3[%c0_44, %c0_45], %84 {strides = array<i32>} : memref<7x128xf32, #tpu.memory_space<vmem>>, vector<4x48xf32>,
    %c4_46 = arith.constant 4 : index
    %c0_47 = arith.constant 0 : index
    %101 = vector.load %arg3[%c4_46, %c0_47] : memref<7x128xf32, #tpu.memory_space<vmem>>, vector<2x128xf32>
    tpu.vector_store %arg3[%c4_46, %c0_47], %22 {strides = array<i32>} : memref<7x128xf32, #tpu.memory_space<vmem>>, vector<2x128xf32>,
    %c6_48 = arith.constant 6 : index
    %c0_49 = arith.constant 0 : index
    %102 = vector.load %arg3[%c6_48, %c0_49] : memref<7x128xf32, #tpu.memory_space<vmem>>, vector<1x128xf32>
    tpu.vector_store %arg3[%c6_48, %c0_49], %99 {strides = array<i32>} : memref<7x128xf32, #tpu.memory_space<vmem>>, vector<1x128xf32>,
    return
  }
}

</mosaic_0001>

<bundles_post_ra>
// kernel: pbigan_forward.1
= control target key start
LH: loop header
LB: loop body
LE: loop exit
PB: predicated region body
PF: predicated region fallthrough
CT: control target
= control target key end

     0   :  { %vm261_vm0 = vcmask 1041408   ;;  %vm575_vm1 = vcmask 261120   ;;  %s1341_s28 = smov 64   ;;  %vm917_vm2 = vcmask 130112   ;;  %vm928_vm3 = vcmask 1041409   ;;  %s1829_s0 = inlined_call_operand.vmem [shape: bf16[768,128], index: 0, kind: input, shape index: {}]   ;;  %s1830_s1 = inlined_call_operand.vmem [shape: f32[15,128], index: 1, kind: input, shape index: {}]   ;;  %s1831_s3 = inlined_call_operand.vmem [shape: f32[7,128], index: 3, kind: output, shape index: {}]   ;;  %s1832_s2 = inlined_call_operand.vmem [shape: f32[4,16,96], index: 2, kind: input, shape index: {}]  }
   0x1   :  { %v1226_v0 = vld [vmem:[%s1829_s0 + $0x38] sm:$0xff]  ;;  %v1225_v1 = vld [vmem:[%s1829_s0 + $0x30] sm:$0xff]  ;;  %v1224_v3 = vld [vmem:[%s1829_s0 + $0x28] sm:$0xff]  ;;  %vm930_vm4 = vcmask 1042434   ;;  %vm974_vm5 = vcmask 392512   ;;  %vm932_vm6 = vcmask 1043459  }
   0x2   :  { %82 = vmatpush.bf16.msra.mxu0 %v1226_v0  ;;  %v1234_v2 = vld [vmem:[%s1829_s0 + $0x78] sm:$0xff]  ;;  %v1233_v4 = vld [vmem:[%s1829_s0 + $0x70] sm:$0xff]  ;;  %v1232_v5 = vld [vmem:[%s1829_s0 + $0x68] sm:$0xff]  ;;  %vm947_vm7 = vcmask 261312   ;;  %vm989_vm8 = vcmask 130048   ;;  %vm1019_vm9 = vcmask 388096  }
   0x3   :  { %163 = vmatpush.bf16.msra.mxu1 %v1234_v2  ;;  %v1223_v6 = vld [vmem:[%s1829_s0 + $0x20] sm:$0xff]  ;;  %v1222_v8 = vld [vmem:[%s1829_s0 + $0x18] sm:$0xff]  ;;  %v1221_v10 = vld [vmem:[%s1829_s0 + $0x10] sm:$0xff]  ;;  %vm1006_vm10 = vcmask 386048   ;;  %vm1014_vm11 = vcmask 392192  }
   0x4   :  { %v1231_v7 = vld [vmem:[%s1829_s0 + $0x60] sm:$0xff]  ;;  %v1230_v9 = vld [vmem:[%s1829_s0 + $0x58] sm:$0xff]  ;;  %v1229_v11 = vld [vmem:[%s1829_s0 + $0x50] sm:$0xff] }
   0x5   :  { %v1220_v12 = vld [vmem:[%s1829_s0 + $0x8] sm:$0xff]  ;;  %v1219_v13 = vld [vmem:[%s1829_s0] sm:$0xff]  ;;  %v1242_v18 = vld [vmem:[%s1829_s0 + $0xb8] sm:$0xff] }
   0x6   :  { %83 = vmatpush.bf16.msra.mxu0 %v1225_v1  ;;  %v14_v14 = vld [vmem:[%s1830_s1] sm:$0x3]  ;;  %v1228_v16 = vld [vmem:[%s1829_s0 + $0x48] sm:$0xff]  ;;  %244 = vmatpush.bf16.msra.mxu2 %v1242_v18  ;;  %v1241_v19 = vld [vmem:[%s1829_s0 + $0xb0] sm:$0xff] }
   0x7   :  { %164 = vmatpush.bf16.msra.mxu1 %v1233_v4  ;;  %v15_v15 = vpack.c.bf16 %v14_v14, %v14_v14  ;;  %v1227_v17 = vld [vmem:[%s1829_s0 + $0x40] sm:$0xff]  ;;  %v1240_v20 = vld [vmem:[%s1829_s0 + $0xa8] sm:$0xff]  ;;  %v1238_v22 = vld [vmem:[%s1829_s0 + $0x98] sm:$0xff] }
   0x8   :  { %v1239_v21 = vld [vmem:[%s1829_s0 + $0xa0] sm:$0xff]  ;;  %v1237_v23 = vld [vmem:[%s1829_s0 + $0x90] sm:$0xff]  ;;  %v1269_v24 = vld [vmem:[%s1830_s1 + $0x9] ss:$0 sm:$0xff] }
   0x9   :  { %v1236_v30 = vld [vmem:[%s1829_s0 + $0x88] sm:$0xff]  ;;  %v1235_v31 = vld [vmem:[%s1829_s0 + $0x80] sm:$0xff]  ;;  %v1250_v32 = vld [vmem:[%s1829_s0 + $0xf8] sm:$0xff] }
   0xa   :  { %84 = vmatpush.bf16.msra.mxu0 %v1224_v3  ;;  %245 = vmatpush.bf16.msra.mxu2 %v1241_v19  ;;  %v1249_v33 = vld [vmem:[%s1829_s0 + $0xf0] sm:$0xff]  ;;  %v1248_v34 = vld [vmem:[%s1829_s0 + $0xe8] sm:$0xff]  ;;  %v1247_v35 = vld [vmem:[%s1829_s0 + $0xe0] sm:$0xff] }
   0xb   :  { %165 = vmatpush.bf16.msra.mxu1 %v1232_v5  ;;  %330 = vmatpush.bf16.msra.mxu3 %v1250_v32  ;;  %v1246_v36 = vld [vmem:[%s1829_s0 + $0xd8] sm:$0xff]  ;;  %v1245_v37 = vld [vmem:[%s1829_s0 + $0xd0] sm:$0xff]  ;;  %v1270_v38 = vld [vmem:[%s1830_s1 + $0xa] ss:$0 sm:$0xff] }
   0xc   :  { %v1244_v44 = vld [vmem:[%s1829_s0 + $0xc8] sm:$0xff]  ;;  %v1243_v45 = vld [vmem:[%s1829_s0 + $0xc0] sm:$0xff]  ;;  %v1258_v46 = vld [vmem:[%s1829_s0 + $0x138] sm:$0xff] }
   0xd   :  { %v1257_v47 = vld [vmem:[%s1829_s0 + $0x130] sm:$0xff]  ;;  %v1256_v48 = vld [vmem:[%s1829_s0 + $0x128] sm:$0xff]  ;;  %v1255_v49 = vld [vmem:[%s1829_s0 + $0x120] sm:$0xff] }
   0xe   :  { %85 = vmatpush.bf16.msra.mxu0 %v1223_v6  ;;  %246 = vmatpush.bf16.msra.mxu2 %v1240_v20  ;;  %v1254_v50 = vld [vmem:[%s1829_s0 + $0x118] sm:$0xff]  ;;  %v1253_v51 = vld [vmem:[%s1829_s0 + $0x110] sm:$0xff]  ;;  %v1271_v52 = vld [vmem:[%s1830_s1 + $0xb] ss:$0 sm:$0xff] }
   0xf   :  { %166 = vmatpush.bf16.msra.mxu1 %v1231_v7  ;;  %331 = vmatpush.bf16.msra.mxu3 %v1249_v33  ;;  %v257_v55 = vld [vmem:[%s1830_s1 + $0x2] sm:$0x3]  ;;  %v1252_v60 = vld [vmem:[%s1829_s0 + $0x108] sm:$0xff]  ;;  %v508_v1 = vld [vmem:[%s1832_s2 + $0x10] sm:$0xff] }
  0x10   :  { %v1251_v61 = vld [vmem:[%s1829_s0 + $0x100] sm:$0xff]  ;;  %v507_v62 = vld [vmem:[%s1832_s2 + $0x8] sm:$0xff]  ;;  %v509_v7 = vld [vmem:[%s1832_s2 + $0x18] sm:$0xff] }
  0x11   :  { %v1273_v63 = vld [vmem:[%s1830_s1 + $0x8] ss:$0 sm:$0xff]  ;;  %v510_v0 = vld [vmem:[%s1832_s2 + $0x20] sm:$0xff] }
  0x12   :  { %86 = vmatpush.bf16.msra.mxu0 %v1222_v8  ;;  %247 = vmatpush.bf16.msra.mxu2 %v1239_v21  ;;  %v516_v2 = vsub.f32 %v507_v62, %v1273_v63  ;;  %v519_v3 = vsub.f32 %v510_v0, %v1273_v63  ;;  %v517_v4 = vsub.f32 %v508_v1, %v1273_v63  ;;  %v511_v5 = vld [vmem:[%s1832_s2 + $0x28] sm:$0xff]  ;;  %v506_v6 = vld [vmem:[%s1832_s2] sm:$0xff]  ;;  %v513_v8 = vld [vmem:[%s1832_s2 + $0x38] sm:$0xff] }
  0x13   :  { %167 = vmatpush.bf16.msra.mxu1 %v1230_v9  ;;  %332 = vmatpush.bf16.msra.mxu3 %v1248_v34  ;;  %v520_v9 = vsub.f32 %v511_v5, %v1273_v63  ;;  %v522_v20 = vsub.f32 %v513_v8, %v1273_v63  ;;  %v1265_v62 = vld [vmem:[%s1829_s0 + $0x170] sm:$0xff]  ;;  %v1263_v0 = vld [vmem:[%s1829_s0 + $0x160] sm:$0xff]  ;;  %v1262_v1 = vld [vmem:[%s1829_s0 + $0x158] sm:$0xff] }
  0x14   :  { %v525_v14 = vmul.f32 %v517_v4, %v517_v4  ;;  %v1259_v4 = vld [vmem:[%s1829_s0 + $0x140] sm:$0xff] }
  0x16   :  { %87 = vmatpush.bf16.msra.mxu0 %v1221_v10  ;;  %248 = vmatpush.bf16.msra.mxu2 %v1238_v22  ;;  %v515_v10 = vsub.f32 %v506_v6, %v1273_v63  ;;  %v533_v19 = vmul.f32 -2.0, %v525_v14 }
  0x17   :  { %168 = vmatpush.bf16.msra.mxu1 %v1229_v11  ;;  %333 = vmatpush.bf16.msra.mxu3 %v1247_v35  ;;  %v518_v11 = vsub.f32 %v509_v7, %v1273_v63 }
  0x19   :  { %v526_v22 = vmul.f32 %v518_v11, %v518_v11 }
  0x1a   :  { %88 = vmatpush.bf16.msra.mxu0 %v1220_v12  ;;  %249 = vmatpush.bf16.msra.mxu2 %v1237_v23  ;;  %v524_v12 = vmul.f32 %v516_v2, %v516_v2  ;;  %v1261_v2 = vld [vmem:[%s1829_s0 + $0x150] sm:$0xff] }
  0x1b   :  { %169 = vmatpush.bf16.msra.mxu1 %v1228_v16  ;;  %334 = vmatpush.bf16.msra.mxu3 %v1246_v36  ;;  %v523_v16 = vmul.f32 %v515_v10, %v515_v10  ;;  %v1274_v10 = vld [vmem:[%s1830_s1 + $0xd] ss:$0 sm:$0xff] }
  0x1d   :  { %v531_v21 = vmul.f32 -2.0, %v523_v16 }
  0x1e   :  { %89 = vmatpush.bf16.msra.mxu0 %v1219_v13  ;;  %250 = vmatpush.bf16.msra.mxu2 %v1236_v30  ;;  %v527_v13 = vmul.f32 %v519_v3, %v519_v3  ;;  %v1260_v3 = vld [vmem:[%s1829_s0 + $0x148] sm:$0xff] }
  0x1f   :  { %170 = vmatpush.bf16.msra.mxu1 %v1227_v17  ;;  %335 = vmatpush.bf16.msra.mxu3 %v1245_v37  ;;  %v532_v17 = vmul.f32 -2.0, %v524_v12 }
  0x20   :  { %v535_v18 = vmul.f32 -2.0, %v527_v13 }
  0x21   :  { %90 = vmatmul.bf16.vlgmr.msra.gmra.mxu0 %v15_v15  ;;  %v528_v15 = vmul.f32 %v520_v9, %v520_v9  ;;  %v541_v23 = vmul.f32 1.442695, %v532_v17 }
  0x22   :  { %251 = vmatpush.bf16.msra.mxu2 %v1235_v31  ;;  %411 = vmatpush.bf16.msrb.mxu0 %v1258_v46 }
  0x23   :  { %336 = vmatpush.bf16.msra.mxu3 %v1244_v44  ;;  %1276 = vpow2.f32 %v541_v23 }
  0x26   :  { %412 = vmatpush.bf16.msrb.mxu0 %v1257_v47 }
  0x27   :  { %337 = vmatpush.bf16.msra.mxu3 %v1243_v45 }
  0x29   :  { %v1524_v33 = vpop.eup %1276 }
  0x2a   :  { %413 = vmatpush.bf16.msrb.mxu0 %v1256_v48  ;;  %v603_v34 = vsel %vm575_vm1, %v1524_v33, 0.0 }
  0x2b   :  { %604 = vadd.xlane.f32.xlu0 %v603_v34 }
  0x2e   :  { %414 = vmatpush.bf16.msrb.mxu0 %v1255_v49 }
  0x32   :  { %415 = vmatpush.bf16.msrb.mxu0 %v1254_v50 }
  0x36   :  { %416 = vmatpush.bf16.msrb.mxu0 %v1253_v51 }
  0x3a   :  { %417 = vmatpush.bf16.msrb.mxu0 %v1252_v60 }
  0x3e   :  { %418 = vmatpush.bf16.msrb.mxu0 %v1251_v61  ;;  %v1266_v61 = vld [vmem:[%s1829_s0 + $0x178] sm:$0xff] }
  0x3f   :  { %492 = vmatpush.bf16.msrb.mxu1 %v1266_v61 }
  0x43   :  { %493 = vmatpush.bf16.msrb.mxu1 %v1265_v62 }
  0x9e   :  { %v91_v25 = vpop.f32.mrf.mxu0  ;;  %v1618_v5 = vpop.xlane.xlu0 %604 }
  0x9f   :  { %v92_v26 = vadd.f32 %v1269_v24, %v91_v25  ;;  %v543_v24 = vmul.f32 1.442695, %v533_v19  ;;  %v536_v25 = vmul.f32 -2.0, %v528_v15 }
  0xa1   :  { %v95_v27 = vmax.f32 %v92_v26, 0.0  ;;  %v547_v26 = vmul.f32 1.442695, %v535_v18  ;;  %1278 = vpow2.f32 %v543_v24  ;;  %v549_v30 = vmul.f32 1.442695, %v536_v25 }
  0xa3   :  { %v96_v28 = vpack.c.bf16 %v95_v27, %v95_v27  ;;  %v530_v27 = vmul.f32 %v522_v20, %v522_v20  ;;  %1280 = vpow2.f32 %v547_v26 }
  0xa5   :  { %171 = vmatmul.bf16.vlgmr.msra.gmra.mxu1 %v96_v28  ;;  %v539_v28 = vmul.f32 1.442695, %v531_v21  ;;  %v538_v31 = vmul.f32 -2.0, %v530_v27 }
  0xa6   :  { %v93_v29 = vpop.f32.mrf.mxu0 }
  0xa7   :  { %v534_v29 = vmul.f32 -2.0, %v526_v22  ;;  %1282 = vpow2.f32 %v539_v28  ;;  %v1528_v35 = vpop.eup %1278  ;;  %v553_v36 = vmul.f32 1.442695, %v538_v31 }
  0xa8   :  { %1284 = vpow2.f32 %v549_v30  ;;  %v606_v37 = vsel %vm575_vm1, %v1528_v35, 0.0 }
  0xa9   :  { %v545_v32 = vmul.f32 1.442695, %v534_v29  ;;  %607 = vadd.xlane.f32.xlu1 %v606_v37 }
  0xab   :  { %1286 = vpow2.f32 %v545_v32 }
  0xac   :  { %1288 = vpow2.f32 %v553_v36 }
 0x11c   :  { %v1622_v7 = vpop.xlane.xlu1 %607 }
 0x122   :  { %v172_v39 = vpop.f32.mrf.mxu1 }
 0x123   :  { %v173_v40 = vadd.f32 %v1270_v38, %v172_v39  ;;  %v1532_v38 = vpop.eup %1280 }
 0x124   :  { %v1534_v39 = vpop.eup %1282  ;;  %v612_v44 = vsel %vm575_vm1, %v1532_v38, 0.0 }
 0x125   :  { %v176_v41 = vmax.f32 %v173_v40, 0.0  ;;  %v1272_v40 = vld [vmem:[%s1830_s1 + $0xc] ss:$0 sm:$0xff]  ;;  %613 = vadd.xlane.f32.xlu0 %v612_v44 }
 0x127   :  { %v177_v42 = vpack.c.bf16 %v176_v41, %v176_v41  ;;  %v1539_v41 = vpop.eup %1284 }
 0x128   :  { %v1548_v47 = vpop.eup %1286  ;;  %v615_v49 = vsel %vm575_vm1, %v1539_v41, 0.0 }
 0x129   :  { %252 = vmatmul.bf16.vlgmr.msra.gmra.mxu2 %v177_v42  ;;  %v600_v42 = vsel %vm575_vm1, %v1534_v39, 0.0  ;;  %616 = vadd.xlane.f32.xlu1 %v615_v49 }
 0x12a   :  { %v174_v43 = vpop.f32.mrf.mxu1  ;;  %601 = vadd.xlane.f32.xlu2 %v600_v42 }
 0x12b   :  { %v512_v43 = vld [vmem:[%s1832_s2 + $0x30] sm:$0xff]  ;;  %s1340_s2 = smov 96  }
 0x12c   :  { %v521_v45 = vsub.f32 %v512_v43, %v1273_v63  ;;  %v1264_v63 = vld [vmem:[%s1829_s0 + $0x168] sm:$0xff] }
 0x12d   :  { %494 = vmatpush.bf16.msrb.mxu1 %v1264_v63 }
 0x12e   :  { %v529_v50 = vmul.f32 %v521_v45, %v521_v45 }
 0x131   :  { %495 = vmatpush.bf16.msrb.mxu1 %v1263_v0 }
 0x135   :  { %496 = vmatpush.bf16.msrb.mxu1 %v1262_v1 }
 0x139   :  { %497 = vmatpush.bf16.msrb.mxu1 %v1261_v2 }
 0x13d   :  { %498 = vmatpush.bf16.msrb.mxu1 %v1260_v3 }
 0x141   :  { %499 = vmatpush.bf16.msrb.mxu1 %v1259_v4 }
 0x142   :  { %712 = vrot.lane.b32.xlu1 %v1534_v39, %s1340_s2 }
 0x14a   :  { %720 = vrot.lane.b32.xlu1 %v1532_v38, %s1340_s2 }
 0x198   :  { %v1624_v8 = vpop.xlane.xlu0 %613 }
 0x19c   :  { %v1631_v13 = vpop.xlane.xlu1 %616 }
 0x19d   :  { %v1620_v6 = vpop.xlane.xlu2 %601 }
 0x1ac   :  { %v253_v53 = vpop.f32.mrf.mxu2 }
 0x1ad   :  { %v254_v54 = vadd.f32 %v1271_v52, %v253_v53  ;;  %v537_v52 = vmul.f32 -2.0, %v529_v50  ;;  %v1552_v53 = vpop.eup %1288 }
 0x1ae   :  { %726 = vrot.lane.b32.xlu1 %v1552_v53, %s1340_s2 }
 0x1af   :  { %v259_v56 = vrot.slane %v254_v54, 6  ;;  %1021 = vst [vmem:[%s1831_s3 + $0x4] sm:$0x3] %v254_v54  ;;  %v609_v54 = vsel %vm575_vm1, %v1548_v47, 0.0 }
 0x1b0   :  { %610 = vadd.xlane.f32.xlu2 %v609_v54 }
 0x1b1   :  { %v262_v57 = vsel %vm261_vm0, %v257_v55, %v259_v56  ;;  %v551_v56 = vmul.f32 1.442695, %v537_v52 }
 0x1b2   :  { %v263_v58 = vpack.c.bf16 %v262_v57, %v262_v57  ;;  %v621_v57 = vsel %vm575_vm1, %v1552_v53, 0.0 }
 0x1b3   :  { %1290 = vpow2.f32 %v551_v56  ;;  %622 = vadd.xlane.f32.xlu0 %v621_v57 }
 0x1b4   :  { %v255_v59 = vpop.f32.mrf.mxu2  ;;  %338 = vmatmul.bf16.vlgmr.msra.gmra.mxu3 %v263_v58  ;;  %v713_v19 = vpop.permute.xlu1 %712 }
 0x1b5   :  { %v736_v21 = vsel %vm575_vm1, %v713_v19, 0.0 }
 0x1b6   :  { %834 = vrot.lane.b32.xlu1 %v1524_v33, %s1341_s28 }
 0x1b9   :  { %v1558_v59 = vpop.eup %1290 }
 0x1ba   :  { %v618_v60 = vsel %vm575_vm1, %v1558_v59, 0.0 }
 0x1bb   :  { %619 = vadd.xlane.f32.xlu2 %v618_v60 }
 0x1bc   :  { %v721_v25 = vpop.permute.xlu1 %720 }
 0x1bd   :  { %v748_v27 = vsel %vm575_vm1, %v721_v25, 0.0 }
 0x1be   :  { %838 = vrot.lane.b32.xlu1 %v1548_v47, %s1341_s28 }
 0x1c6   :  { %842 = vrot.lane.b32.xlu1 %v1539_v41, %s1341_s28 }
 0x1c7   :  { %714 = vrot.lane.b32.xlu0 %v1524_v33, %s1340_s2 }
 0x1ce   :  { %846 = vrot.lane.b32.xlu1 %v1552_v53, %s1341_s28 }
 0x1cf   :  { %718 = vrot.lane.b32.xlu0 %v1548_v47, %s1340_s2 }
 0x1d3   :  { %716 = vrot.lane.b32.xlu2 %v1528_v35, %s1340_s2 }
 0x1d7   :  { %724 = vrot.lane.b32.xlu0 %v1558_v59, %s1340_s2 }
 0x1db   :  { %722 = vrot.lane.b32.xlu2 %v1539_v41, %s1340_s2 }
 0x1df   :  { %832 = vrot.lane.b32.xlu0 %v1534_v39, %s1341_s28 }
 0x1e7   :  { %836 = vrot.lane.b32.xlu0 %v1528_v35, %s1341_s28 }
 0x1ef   :  { %840 = vrot.lane.b32.xlu0 %v1532_v38, %s1341_s28 }
 0x1f7   :  { %844 = vrot.lane.b32.xlu0 %v1558_v59, %s1341_s28 }
 0x204   :  { %737 = vadd.xlane.f32.xlu2 %v736_v21 }
 0x220   :  { %v727_v30 = vpop.permute.xlu1 %726 }
 0x223   :  { %v1626_v9 = vpop.xlane.xlu2 %610 }
 0x226   :  { %v1633_v14 = vpop.xlane.xlu0 %622 }
 0x228   :  { %v835_v34 = vpop.permute.xlu1 %834 }
 0x229   :  { %v859_v37 = vsel %vm575_vm1, %v835_v34, 0.0 }
 0x22e   :  { %v1635_v16 = vpop.xlane.xlu2 %619 }
 0x230   :  { %v839_v43 = vpop.permute.xlu1 %838 }
 0x231   :  { %v865_v45 = vsel %vm575_vm1, %v839_v43, 0.0 }
 0x236   :  { %v717_v22 = vpop.permute.xlu2 %716 }
 0x237   :  { %v339_v46 = vpop.f32.mrf.mxu3  ;;  %v742_v24 = vsel %vm575_vm1, %v717_v22, 0.0 }
 0x238   :  { %v340_v48 = vadd.f32 %v1272_v40, %v339_v46  ;;  %743 = vadd.xlane.f32.xlu0 %v742_v24  ;;  %v843_v49 = vpop.permute.xlu1 %842 }
 0x239   :  { %v715_v20 = vpop.permute.xlu0 %714 }
 0x23a   :  { %v343_v51 = vmax.f32 %v340_v48, 0.0  ;;  %v739_v23 = vsel %vm575_vm1, %v715_v20, 0.0  ;;  %v757_v48 = vsel %vm575_vm1, %v727_v30, 0.0 }
 0x23b   :  { %740 = vadd.xlane.f32.xlu1 %v739_v23 }
 0x23c   :  { %v344_v55 = vpack.c.bf16 %v343_v51, %v343_v51  ;;  %v871_v51 = vsel %vm575_vm1, %v843_v49, 0.0 }
 0x23e   :  { %419 = vmatmul.bf16.vlgmr.msrb.gmra.mxu0 %v344_v55  ;;  %v723_v29 = vpop.permute.xlu2 %722 }
 0x23f   :  { %v341_v58 = vpop.f32.mrf.mxu3  ;;  %v751_v31 = vsel %vm575_vm1, %v723_v29, 0.0 }
 0x240   :  { %v847_v54 = vpop.permute.xlu1 %846  ;;  %v1275_v58 = vld [vmem:[%s1830_s1 + $0xe] ss:$0 sm:$0xff] }
 0x241   :  { %v719_v26 = vpop.permute.xlu0 %718  ;;  %v877_v56 = vsel %vm575_vm1, %v847_v54, 0.0 }
 0x242   :  { %v745_v28 = vsel %vm575_vm1, %v719_v26, 0.0 }
 0x243   :  { %746 = vadd.xlane.f32.xlu2 %v745_v28  ;;  %749 = vadd.xlane.f32.xlu1 %v748_v27 }
 0x249   :  { %v725_v32 = vpop.permute.xlu0 %724 }
 0x24a   :  { %v754_v42 = vsel %vm575_vm1, %v725_v32, 0.0 }
 0x24b   :  { %752 = vadd.xlane.f32.xlu2 %v751_v31  ;;  %860 = vadd.xlane.f32.xlu1 %v859_v37 }
 0x251   :  { %v833_v36 = vpop.permute.xlu0 %832 }
 0x252   :  { %v856_v40 = vsel %vm575_vm1, %v833_v36, 0.0 }
 0x253   :  { %857 = vadd.xlane.f32.xlu0 %v856_v40  ;;  %755 = vadd.xlane.f32.xlu1 %v754_v42 }
 0x259   :  { %v837_v44 = vpop.permute.xlu0 %836 }
 0x25a   :  { %v862_v46 = vsel %vm575_vm1, %v837_v44, 0.0 }
 0x25b   :  { %863 = vadd.xlane.f32.xlu2 %v862_v46  ;;  %866 = vadd.xlane.f32.xlu0 %v865_v45 }
 0x25c   :  { %872 = vadd.xlane.f32.xlu1 %v871_v51 }
 0x261   :  { %v841_v50 = vpop.permute.xlu0 %840 }
 0x262   :  { %v868_v52 = vsel %vm575_vm1, %v841_v50, 0.0 }
 0x263   :  { %758 = vadd.xlane.f32.xlu2 %v757_v48  ;;  %869 = vadd.xlane.f32.xlu0 %v868_v52 }
 0x269   :  { %v845_v55 = vpop.permute.xlu0 %844 }
 0x26a   :  { %v874_v57 = vsel %vm575_vm1, %v845_v55, 0.0 }
 0x26b   :  { %875 = vadd.xlane.f32.xlu2 %v874_v57  ;;  %878 = vadd.xlane.f32.xlu0 %v877_v56  ;;  %v624_v56 = vadd.f32 1e-06, %v1620_v6 }
 0x26d   :  { %1292 = vrcp.f32 %v624_v56 }
 0x2ab   :  { %v1684_v21 = vpop.xlane.xlu0 %743 }
 0x2ae   :  { %v1688_v24 = vpop.xlane.xlu1 %740 }
 0x2b6   :  { %v1697_v28 = vpop.xlane.xlu1 %749 }
 0x2bb   :  { %v420_v11 = vpop.f32.mrf.mxu0 }
 0x2bc   :  { %v421_v12 = vadd.f32 %v1274_v10, %v420_v11 }
 0x2be   :  { %v424_v15 = vmax.f32 %v421_v12, 0.0  ;;  %v1705_v30 = vpop.xlane.xlu1 %860 }
 0x2c0   :  { %v425_v17 = vpack.c.bf16 %v424_v15, %v424_v15 }
 0x2c2   :  { %500 = vmatmul.bf16.vlgmr.msrb.gmra.mxu1 %v425_v17 }
 0x2c3   :  { %v422_v18 = vpop.f32.mrf.mxu0 }
 0x2c6   :  { %v1694_v27 = vpop.xlane.xlu0 %857  ;;  %v1713_v40 = vpop.xlane.xlu1 %755 }
 0x2cf   :  { %v1718_v43 = vpop.xlane.xlu1 %872 }
 0x33f   :  { %v501_v60 = vpop.f32.mrf.mxu1 }
 0x340   :  { %v502_v61 = vadd.f32 %v1275_v58, %v501_v60 }
 0x342   :  { %v559_v62 = vperm.slane %v502_v61, 0  ;;  %v556_v1 = vrot.slane %v502_v61, 1  ;;  %v558_v10 = vrot.slane %v502_v61, 3  ;;  %v557_v11 = vrot.slane %v502_v61, 2 }
 0x344   :  { %v568_v63 = vmul.f32 %v1524_v33, %v559_v62  ;;  %v567_v0 = vmul.f32 %v1534_v39, %v559_v62  ;;  %v560_v3 = vperm.slane %v556_v1, 0  ;;  %v562_v33 = vperm.slane %v558_v10, 0 }
 0x345   :  { %v561_v12 = vperm.slane %v557_v11, 0  ;;  %v625_v62 = vadd.f32 1e-06, %v1618_v5  ;;  %v912_v1 = vlaneseq }
 0x346   :  { %658 = vrot.lane.b32.xlu2 %v568_v63, %s1340_s2  ;;  %784 = vrot.lane.b32.xlu0 %v567_v0, %s1341_s28  ;;  %v570_v4 = vmul.f32 %v1548_v47, %v560_v3  ;;  %v573_v39 = vmul.f32 %v1558_v59, %v562_v33  ;;  %v574_v17 = vmul.f32 %v1552_v53, %v562_v33  ;;  %v1671_v47 = vpop.xlane.xlu2 %737  ;;  %v576_v59 = vsel %vm575_vm1, %v567_v0, 0.0 }
 0x347   :  { %656 = vrot.lane.b32.xlu1 %v567_v0, %s1340_s2  ;;  %v503_v2 = vpop.f32.mrf.mxu1  ;;  %v571_v15 = vmul.f32 %v1532_v38, %v561_v12  ;;  %v579_v38 = vsel %vm575_vm1, %v568_v63, 0.0  ;;  %v569_v22 = vmul.f32 %v1528_v35, %v560_v3  ;;  %v572_v23 = vmul.f32 %v1539_v41, %v561_v12  ;;  %v1702_v41 = vpop.xlane.xlu0 %866 }
 0x348   :  { %v585_v32 = vsel %vm575_vm1, %v570_v4, 0.0  ;;  %v597_v37 = vsel %vm575_vm1, %v574_v17, 0.0  ;;  %v594_v55 = vsel %vm575_vm1, %v573_v39, 0.0  ;;  %1294 = vrcp.f32 %v625_v62 }
 0x349   :  { %v588_v20 = vsel %vm575_vm1, %v571_v15, 0.0  ;;  %v591_v26 = vsel %vm575_vm1, %v572_v23, 0.0  ;;  %v582_v35 = vsel %vm575_vm1, %v569_v22, 0.0 }
 0x34e   :  { %662 = vrot.lane.b32.xlu2 %v570_v4, %s1340_s2  ;;  %v1676_v18 = vpop.xlane.xlu2 %746 }
 0x34f   :  { %786 = vrot.lane.b32.xlu1 %v568_v63, %s1341_s28  ;;  %v1710_v36 = vpop.xlane.xlu0 %869  ;;  %v1293_v63 = vpop.eup %1292 }
 0x350   :  { %v1295_v11 = vpop.eup %1294 }
 0x356   :  { %668 = vrot.lane.b32.xlu2 %v573_v39, %s1340_s2  ;;  %v1679_v19 = vpop.xlane.xlu2 %752 }
 0x357   :  { %664 = vrot.lane.b32.xlu1 %v571_v15, %s1340_s2  ;;  %v1716_v42 = vpop.xlane.xlu0 %878 }
 0x35e   :  { %790 = vrot.lane.b32.xlu2 %v570_v4, %s1341_s28  ;;  %v1681_v53 = vpop.xlane.xlu2 %863  ;;  %v1730_v4 = vand.u32 127, %v912_v1 }
 0x35f   :  { %670 = vrot.lane.b32.xlu1 %v574_v17, %s1340_s2 }
 0x360   :  { %v1733_v10 = vadd.s32 4294967288, %v1730_v4 }
 0x366   :  { %v1691_v25 = vpop.xlane.xlu2 %758 }
 0x367   :  { %792 = vrot.lane.b32.xlu1 %v571_v15, %s1341_s28 }
 0x36e   :  { %v1699_v29 = vpop.xlane.xlu2 %875 }
 0x36f   :  { %796 = vrot.lane.b32.xlu1 %v573_v39, %s1341_s28 }
 0x370   :  { %577 = vadd.xlane.f32.xlu0 %v576_v59 }
 0x378   :  { %580 = vadd.xlane.f32.xlu0 %v579_v38  ;;  %v628_v38 = vadd.f32 1e-06, %v1624_v8 }
 0x37a   :  { %1296 = vrcp.f32 %v628_v38  ;;  %v1761_v38 = vadd.s32 4294967264, %v1730_v4 }
 0x387   :  { %589 = vadd.xlane.f32.xlu2 %v588_v20  ;;  %v629_v20 = vadd.f32 1e-06, %v1631_v13 }
 0x389   :  { %1298 = vrcp.f32 %v629_v20  ;;  %v1764_v20 = vadd.s32 4294967256, %v1730_v4 }
 0x38c   :  { %660 = vrot.lane.b32.xlu0 %v569_v22, %s1340_s2 }
 0x38f   :  { %592 = vadd.xlane.f32.xlu2 %v591_v26 }
 0x394   :  { %666 = vrot.lane.b32.xlu0 %v572_v23, %s1340_s2 }
 0x399   :  { %583 = vadd.xlane.f32.xlu1 %v582_v35  ;;  %v1297_v35 = vpop.eup %1296 }
 0x39c   :  { %788 = vrot.lane.b32.xlu0 %v569_v22, %s1341_s28 }
 0x3a0   :  { %v659_v31 = vpop.permute.xlu2 %658 }
 0x3a1   :  { %586 = vadd.xlane.f32.xlu1 %v585_v32  ;;  %v683_v34 = vsel %vm575_vm1, %v659_v31, 0.0  ;;  %v1299_v32 = vpop.eup %1298 }
 0x3a2   :  { %684 = vadd.xlane.f32.xlu2 %v683_v34 }
 0x3a4   :  { %794 = vrot.lane.b32.xlu0 %v572_v23, %s1341_s28 }
 0x3a8   :  { %v663_v61 = vpop.permute.xlu2 %662 }
 0x3a9   :  { %598 = vadd.xlane.f32.xlu1 %v597_v37  ;;  %v689_v3 = vsel %vm575_vm1, %v663_v61, 0.0 }
 0x3ac   :  { %798 = vrot.lane.b32.xlu0 %v574_v17, %s1341_s28 }
 0x3b0   :  { %v669_v6 = vpop.permute.xlu2 %668 }
 0x3b1   :  { %v698_v5 = vsel %vm575_vm1, %v669_v6, 0.0 }
 0x3b8   :  { %v785_v44 = vpop.permute.xlu0 %784  ;;  %v791_v59 = vpop.permute.xlu2 %790 }
 0x3b9   :  { %v657_v45 = vpop.permute.xlu1 %656  ;;  %v808_v46 = vsel %vm575_vm1, %v785_v44, 0.0 }
 0x3ba   :  { %809 = vadd.xlane.f32.xlu1 %v808_v46  ;;  %v680_v60 = vsel %vm575_vm1, %v657_v45, 0.0 }
 0x3c1   :  { %v787_v48 = vpop.permute.xlu1 %786 }
 0x3c2   :  { %v811_v49 = vsel %vm575_vm1, %v787_v48, 0.0 }
 0x3c3   :  { %812 = vadd.xlane.f32.xlu2 %v811_v49  ;;  %v626_v49 = vadd.f32 1e-06, %v1622_v7 }
 0x3c5   :  { %1300 = vrcp.f32 %v626_v49 }
 0x3c9   :  { %v665_v50 = vpop.permute.xlu1 %664 }
 0x3ca   :  { %v692_v51 = vsel %vm575_vm1, %v665_v50, 0.0  ;;  %v627_v50 = vadd.f32 1e-06, %v1626_v9 }
 0x3cb   :  { %693 = vadd.xlane.f32.xlu2 %v692_v51  ;;  %v1301_v56 = vpop.eup %1300 }
 0x3cc   :  { %1302 = vrcp.f32 %v627_v50 }
 0x3d1   :  { %v671_v52 = vpop.permute.xlu1 %670 }
 0x3d2   :  { %v701_v54 = vsel %vm575_vm1, %v671_v52, 0.0 }
 0x3d3   :  { %702 = vadd.xlane.f32.xlu2 %v701_v54 }
 0x3d6   :  { %595 = vadd.xlane.f32.xlu0 %v594_v55  ;;  %v817_v55 = vsel %vm575_vm1, %v791_v59, 0.0 }
 0x3d9   :  { %v793_v57 = vpop.permute.xlu1 %792 }
 0x3da   :  { %v820_v58 = vsel %vm575_vm1, %v793_v57, 0.0 }
 0x3db   :  { %821 = vadd.xlane.f32.xlu2 %v820_v58  ;;  %v1303_v58 = vpop.eup %1302 }
 0x3de   :  { %681 = vadd.xlane.f32.xlu0 %v680_v60 }
 0x3e1   :  { %v797_v44 = vpop.permute.xlu1 %796 }
 0x3e2   :  { %v826_v7 = vsel %vm575_vm1, %v797_v44, 0.0  ;;  %v760_v44 = vadd.f32 1e-06, %v1671_v47 }
 0x3e3   :  { %v578_v0 = vpop.xlane.xlu0 %577 }
 0x3e4   :  { %v640_v2 = vmul.f32 %v1293_v63, %v578_v0 }
 0x3e6   :  { %690 = vadd.xlane.f32.xlu0 %v689_v3  ;;  %v914_v39 = vperm.slane %v640_v2, %v1730_v4 }
 0x3eb   :  { %v581_v33 = vpop.xlane.xlu0 %580 }
 0x3ec   :  { %v641_v12 = vmul.f32 %v1295_v11, %v581_v33  ;;  %v880_v33 = vadd.f32 1e-06, %v1694_v27 }
 0x3ee   :  { %v916_v15 = vperm.slane %v641_v12, %v1733_v10  ;;  %699 = vadd.xlane.f32.xlu0 %v698_v5  ;;  %v881_v5 = vadd.f32 1e-06, %v1705_v30  ;;  %1304 = vrcp.f32 %v880_v33 }
 0x3f0   :  { %v918_v17 = vsel %vm917_vm2, %v916_v15, %v914_v39  ;;  %1306 = vrcp.f32 %v881_v5 }
 0x3f4   :  { %v1305_v59 = vpop.eup %1304 }
 0x3fa   :  { %v590_v22 = vpop.xlane.xlu2 %589 }
 0x3fb   :  { %v644_v31 = vmul.f32 %v1297_v35, %v590_v22  ;;  %v1307_v22 = vpop.eup %1306 }
 0x3fd   :  { %v922_v45 = vperm.slane %v644_v31, %v1730_v4  ;;  %v631_v31 = vadd.f32 1e-06, %v1633_v14 }
 0x3fe   :  { %v661_v23 = vpop.permute.xlu0 %660 }
 0x3ff   :  { %v686_v26 = vsel %vm575_vm1, %v661_v23, 0.0  ;;  %1308 = vrcp.f32 %v631_v31 }
 0x400   :  { %687 = vadd.xlane.f32.xlu1 %v686_v26 }
 0x402   :  { %v593_v34 = vpop.xlane.xlu2 %592 }
 0x403   :  { %v645_v37 = vmul.f32 %v1299_v32, %v593_v34  ;;  %v630_v32 = vadd.f32 1e-06, %v1635_v16  ;;  %v761_v34 = vadd.f32 1e-06, %v1688_v24  ;;  %v945_v24 = vadd.s32 4294967272, %v1730_v4 }
 0x405   :  { %v923_v46 = vperm.slane %v645_v37, %v1733_v10  ;;  %1310 = vrcp.f32 %v630_v32  ;;  %v1309_v37 = vpop.eup %1308 }
 0x406   :  { %v667_v8 = vpop.permute.xlu0 %666  ;;  %1312 = vrcp.f32 %v761_v34 }
 0x407   :  { %v924_v13 = vsel %vm917_vm2, %v923_v46, %v922_v45  ;;  %v695_v48 = vsel %vm575_vm1, %v667_v8, 0.0  ;;  %1314 = vrcp.f32 %v760_v44 }
 0x408   :  { %696 = vadd.xlane.f32.xlu1 %v695_v48 }
 0x40b   :  { %v1311_v46 = vpop.eup %1310 }
 0x40c   :  { %v584_v51 = vpop.xlane.xlu1 %583  ;;  %v1313_v49 = vpop.eup %1312 }
 0x40d   :  { %v642_v57 = vmul.f32 %v1301_v56, %v584_v51  ;;  %v1315_v51 = vpop.eup %1314 }
 0x40e   :  { %v789_v52 = vpop.permute.xlu0 %788 }
 0x40f   :  { %v814_v54 = vsel %vm575_vm1, %v789_v52, 0.0  ;;  %v919_v9 = vperm.slane %v642_v57, %v1730_v4 }
 0x410   :  { %815 = vadd.xlane.f32.xlu0 %v814_v54  ;;  %818 = vadd.xlane.f32.xlu1 %v817_v55  ;;  %v943_v54 = vadd.s32 4294967280, %v1730_v4 }
 0x414   :  { %v587_v60 = vpop.xlane.xlu1 %586 }
 0x415   :  { %v643_v61 = vmul.f32 %v1303_v58, %v587_v60  ;;  %v685_v39 = vpop.xlane.xlu2 %684  ;;  %v767_v58 = vadd.f32 1e-06, %v1691_v25  ;;  %v762_v25 = vadd.f32 1e-06, %v1684_v21 }
 0x416   :  { %v795_v62 = vpop.permute.xlu0 %794  ;;  %v777_v47 = vmul.f32 %v1313_v49, %v685_v39 }
 0x417   :  { %v920_v63 = vperm.slane %v643_v61, %v1733_v10  ;;  %v823_v0 = vsel %vm575_vm1, %v795_v62, 0.0  ;;  %v766_v61 = vadd.f32 1e-06, %v1713_v40  ;;  %1316 = vrcp.f32 %v767_v58 }
 0x418   :  { %824 = vadd.xlane.f32.xlu0 %v823_v0  ;;  %827 = vadd.xlane.f32.xlu1 %v826_v7  ;;  %v764_v40 = vadd.f32 1e-06, %v1697_v28 }
 0x419   :  { %v921_v1 = vsel %vm917_vm2, %v920_v63, %v919_v9  ;;  %1318 = vrcp.f32 %v766_v61 }
 0x41a   :  { %v929_v2 = vsel %vm928_vm3, %v921_v1, %v918_v17 }
 0x41b   :  { %v931_v3 = vsel %vm930_vm4, %v924_v13, %v929_v2 }
 0x41c   :  { %v599_v12 = vpop.xlane.xlu1 %598 }
 0x41d   :  { %v647_v45 = vmul.f32 %v1309_v37, %v599_v12  ;;  %v1317_v9 = vpop.eup %1316  ;;  %v765_v12 = vadd.f32 1e-06, %v1679_v19  ;;  %v884_v37 = vadd.f32 1e-06, %v1710_v36 }
 0x41e   :  { %v799_v6 = vpop.permute.xlu0 %798 }
 0x41f   :  { %v829_v11 = vsel %vm575_vm1, %v799_v6, 0.0  ;;  %v926_v48 = vperm.slane %v647_v45, %v1733_v10  ;;  %v946_v10 = vperm.slane %v777_v47, %v945_v24  ;;  %v1319_v0 = vpop.eup %1318 }
 0x420   :  { %830 = vadd.xlane.f32.xlu2 %v829_v11  ;;  %v763_v11 = vadd.f32 1e-06, %v1676_v18 }
 0x422   :  { %1320 = vrcp.f32 %v763_v11 }
 0x423   :  { %1322 = vrcp.f32 %v762_v25 }
 0x424   :  { %1324 = vrcp.f32 %v764_v40 }
 0x425   :  { %1326 = vrcp.f32 %v765_v12 }
 0x428   :  { %v1321_v33 = vpop.eup %1320 }
 0x429   :  { %v1323_v39 = vpop.eup %1322 }
 0x42a   :  { %v1325_v21 = vpop.eup %1324 }
 0x42d   :  { %v810_v15 = vpop.xlane.xlu1 %809 }
 0x42e   :  { %v896_v17 = vmul.f32 %v1305_v59, %v810_v15 }
 0x430   :  { %v971_v27 = vperm.slane %v896_v17, %v1761_v38 }
 0x436   :  { %v813_v23 = vpop.xlane.xlu2 %812 }
 0x437   :  { %v897_v26 = vmul.f32 %v1307_v22, %v813_v23  ;;  %v882_v23 = vadd.f32 1e-06, %v1681_v53  ;;  %v885_v53 = vadd.f32 1e-06, %v1718_v43  ;;  %v886_v43 = vadd.f32 1e-06, %v1699_v29 }
 0x439   :  { %v973_v30 = vperm.slane %v897_v26, %v1764_v20  ;;  %v883_v26 = vadd.f32 1e-06, %v1702_v41  ;;  %1328 = vrcp.f32 %v882_v23 }
 0x43b   :  { %v1769_v35 = vsel %vm974_vm5, %v973_v30, %v971_v27  ;;  %v1327_v30 = vpop.eup %1326  ;;  %1330 = vrcp.f32 %v883_v26 }
 0x43c   :  { %1332 = vrcp.f32 %v884_v37 }
 0x43d   :  { %1334 = vrcp.f32 %v885_v53 }
 0x43e   :  { %v694_v56 = vpop.xlane.xlu2 %693  ;;  %1336 = vrcp.f32 %v886_v43 }
 0x43f   :  { %v780_v27 = vmul.f32 %v1325_v21, %v694_v56  ;;  %v1329_v41 = vpop.eup %1328 }
 0x441   :  { %v952_v32 = vperm.slane %v780_v27, %v943_v54 }
 0x446   :  { %v703_v7 = vpop.xlane.xlu2 %702 }
 0x447   :  { %v783_v63 = vmul.f32 %v1317_v9, %v703_v7 }
 0x449   :  { %v596_v8 = vpop.xlane.xlu0 %595  ;;  %v956_v2 = vperm.slane %v783_v63, %v945_v24 }
 0x44a   :  { %v646_v13 = vmul.f32 %v1311_v46, %v596_v8  ;;  %v1331_v8 = vpop.eup %1330 }
 0x44c   :  { %v925_v14 = vperm.slane %v646_v13, %v1730_v4 }
 0x44e   :  { %v927_v16 = vsel %vm917_vm2, %v926_v48, %v925_v14  ;;  %v822_v47 = vpop.xlane.xlu2 %821 }
 0x44f   :  { %v1779_v50 = vsel %vm932_vm6, %v927_v16, %v931_v3 }
 0x451   :  { %v682_v52 = vpop.xlane.xlu0 %681 }
 0x452   :  { %v776_v55 = vmul.f32 %v1315_v51, %v682_v52  ;;  %v1333_v52 = vpop.eup %1332 }
 0x453   :  { %v900_v56 = vmul.f32 %v1333_v52, %v822_v47 }
 0x454   :  { %v944_v57 = vperm.slane %v776_v55, %v943_v54 }
 0x455   :  { %v979_v58 = vperm.slane %v900_v56, %v1761_v38 }
 0x456   :  { %v948_v60 = vsel %vm947_vm7, %v946_v10, %v944_v57 }
 0x459   :  { %v691_v62 = vpop.xlane.xlu0 %690 }
 0x45a   :  { %v779_v5 = vmul.f32 %v1321_v33, %v691_v62 }
 0x45c   :  { %v950_v17 = vperm.slane %v779_v5, %v945_v24 }
 0x461   :  { %v700_v1 = vpop.xlane.xlu0 %699 }
 0x462   :  { %v782_v4 = vmul.f32 %v1319_v0, %v700_v1  ;;  %v992_v0 = vld [vmem:[%s1830_s1 + $0x4] sm:$0x3] }
 0x464   :  { %v955_v3 = vperm.slane %v782_v4, %v943_v54 }
 0x466   :  { %v957_v6 = vsel %vm947_vm7, %v956_v2, %v955_v3  ;;  %v995_v2 = vrot.slane %v992_v0, 6 }
 0x473   :  { %v688_v15 = vpop.xlane.xlu1 %687 }
 0x474   :  { %v778_v59 = vmul.f32 %v1323_v39, %v688_v15 }
 0x476   :  { %v949_v22 = vperm.slane %v778_v59, %v943_v54  ;;  %v887_v54 = vadd.f32 1e-06, %v1716_v42 }
 0x478   :  { %v951_v18 = vsel %vm947_vm7, %v950_v17, %v949_v22  ;;  %1338 = vrcp.f32 %v887_v54 }
 0x479   :  { %v958_v28 = vsel %vm928_vm3, %v951_v18, %v948_v60 }
 0x47b   :  { %v697_v19 = vpop.xlane.xlu1 %696 }
 0x47c   :  { %v781_v31 = vmul.f32 %v1327_v30, %v697_v19 }
 0x47e   :  { %v953_v34 = vperm.slane %v781_v31, %v945_v24 }
 0x480   :  { %v954_v44 = vsel %vm947_vm7, %v953_v34, %v952_v32 }
 0x481   :  { %v959_v45 = vsel %vm930_vm4, %v954_v44, %v958_v28 }
 0x482   :  { %v960_v46 = vsel %vm932_vm6, %v957_v6, %v959_v45  ;;  %v993_v6 = vld [vmem:[%s1830_s1 + $0x6] sm:$0x3] }
 0x483   :  { %v816_v13 = vpop.xlane.xlu0 %815  ;;  %v819_v48 = vpop.xlane.xlu1 %818  ;;  %v990_v14 = vsel %vm989_vm8, %v1779_v50, %v960_v46 }
 0x484   :  { %v898_v16 = vmul.f32 %v1329_v41, %v816_v13  ;;  %v899_v49 = vmul.f32 %v1331_v8, %v819_v48  ;;  %v1335_v50 = vpop.eup %1334 }
 0x485   :  { %v1337_v62 = vpop.eup %1336 }
 0x486   :  { %v976_v36 = vperm.slane %v898_v16, %v1761_v38  ;;  %v977_v24 = vperm.slane %v899_v49, %v1764_v20  ;;  %v1339_v9 = vpop.eup %1338 }
 0x488   :  { %v978_v51 = vsel %vm974_vm5, %v977_v24, %v976_v36 }
 0x489   :  { %v985_v55 = vsel %vm928_vm3, %v978_v51, %v1769_v35 }
 0x48b   :  { %v825_v10 = vpop.xlane.xlu0 %824  ;;  %v828_v29 = vpop.xlane.xlu1 %827 }
 0x48c   :  { %v901_v57 = vmul.f32 %v1335_v50, %v825_v10  ;;  %v902_v42 = vmul.f32 %v1337_v62, %v828_v29 }
 0x48e   :  { %v980_v60 = vperm.slane %v901_v57, %v1764_v20  ;;  %v982_v1 = vperm.slane %v902_v42, %v1761_v38  ;;  %v1000_v38 = vrot.slane %v993_v6, 6 }
 0x490   :  { %v981_v61 = vsel %vm974_vm5, %v980_v60, %v979_v58 }
 0x491   :  { %v986_v7 = vsel %vm930_vm4, %v981_v61, %v985_v55 }
 0x493   :  { %v831_v63 = vpop.xlane.xlu2 %830 }
 0x494   :  { %v903_v35 = vmul.f32 %v1339_v9, %v831_v63 }
 0x496   :  { %v983_v4 = vperm.slane %v903_v35, %v1764_v20 }
 0x498   :  { %v984_v3 = vsel %vm974_vm5, %v983_v4, %v982_v1 }
 0x499   :  { %v987_v11 = vsel %vm932_vm6, %v984_v3, %v986_v7 }
 0x49a   :  { %v991_v25 = vsel %vm575_vm1, %v990_v14, %v987_v11 }
 0x49b   :  { %1020 = vst.msk [vmem:[%s1831_s3] sm:$0xf] %vm1019_vm9, %v991_v25  ;;  %v997_v40 = vsub.f32 %v991_v25, %v995_v2 }
 0x49d   :  { %v998_v33 = vmul.f32 %v997_v40, %v997_v40 }
 0x49f   :  { %v1002_v20 = vmul.f32 %v1000_v38, %v998_v33 }
 0x4a1   :  { %v1004_v12 = vrot.slane %v1002_v20, 2 }
 0x4a3   :  { %v1007_v5 = vsel %vm1006_vm10, %v1004_v12, 0.0 }
 0x4a4   :  { %v1008_v39 = vrot.slane %v1007_v5, 4 }
 0x4a6   :  { %v1009_v15 = vadd.f32 %v1008_v39, %v1007_v5 }
 0x4a8   :  { %v1010_v59 = vrot.slane %v1009_v15, 2 }
 0x4aa   :  { %v1011_v17 = vadd.f32 %v1010_v59, %v1009_v15 }
 0x4ac   :  { %v1012_v22 = vrot.slane %v1011_v17, 1 }
 0x4ae   :  { %v1013_v23 = vadd.f32 %v1012_v22, %v1011_v17 }
 0x4b0   :  { %v1015_v18 = vsel %vm1014_vm11, %v1013_v23, 0.0 }
 0x4b1   :  { %1016 = vadd.xlane.f32.xlu0 %v1015_v18 }
 0x524   :  { %v1017_v21 = vpop.xlane.xlu0 %1016 }
 0x525   :  { %v1018_v26 = vmul.f32 0.5, %v1017_v21 }
 0x527   :  { %1022 = vst [vmem:[%s1831_s3 + $0x6] sm:$0x1] %v1018_v26 }

</bundles_post_ra>
